<compile_context>
chip_gen: v6e
topology: v6e:2x2x1
jax: 0.10.0
libtpu: 0.0.40
codegen_flags: <defaults>
</compile_context>

<pallas_src>
import jax
import jax.numpy as jnp
from jax import lax
from jax.experimental import pallas as pl
from jax.experimental.pallas import tpu as pltpu


def _round_up(x, m):
    return (x + m - 1) // m * m


def selector_kernel(x_ref, w_ref, o_ref):
    # x_ref: (tm, Dp)  activations, bias folded in as a constant-1 column
    # w_ref: (1, Dp)   collapsed weights (w1 @ w2, effective bias at col D_in)
    # o_ref: (1, tm)   lane-dense output row
    # Single MXU pass: (1, Dp) contracted against (tm, Dp) on the lane axis
    # of both operands -> (1, tm)  (same orientation as Q @ K^T).
    logit = lax.dot_general(
        w_ref[...], x_ref[...],
        dimension_numbers=(((1,), (1,)), ((), ())),
        preferred_element_type=jnp.float32,
    )
    o_ref[...] = jax.nn.sigmoid(logit).astype(o_ref.dtype)


def selector_forward(state_rep, w1, b1, w2, b2, *, batch_tile=256):
    """sigmoid((x @ w1 + b1) @ w2 + b2).

    Weights stored transposed vs PyTorch: w1 (D_in, 100), b1 (1, 100),
    w2 (100, 1), b2 (1, 1).  Returns (B, 1) like the nn.Module.
    """
    B, D_in = state_rep.shape
    dtype = state_rep.dtype

    # --- Exact algebraic collapse of Linear -> Linear (no activation between) ---
    w_eff = (w1 @ w2).reshape(1, D_in).astype(jnp.float32)    # (1, D_in)
    b_eff = (b1 @ w2 + b2).reshape(1, 1).astype(jnp.float32)  # (1, 1)

    # --- Layout plumbing (once, in the wrapper) ---
    # Fold bias as an extra constant-1 feature, then zero-pad features to a
    # lane-aligned multiple of 128 (zeros contribute nothing to the sum).
    Dp = _round_up(D_in + 1, 128)
    w_pad = jnp.zeros((1, Dp), jnp.float32)
    w_pad = w_pad.at[:, :D_in].set(w_eff).at[:, D_in].set(b_eff[0, 0])

    # Batch: pad to a sublane-aligned tile; tile when large so the activation
    # DMA pipelines against compute.
    tm = batch_tile if B > batch_tile else _round_up(B, 8)
    Bp = _round_up(B, tm)
    x_pad = jnp.zeros((Bp, Dp), jnp.float32)
    x_pad = x_pad.at[:B, :D_in].set(state_rep.astype(jnp.float32))
    x_pad = x_pad.at[:, D_in].set(1.0)  # bias column

    grid = (Bp // tm,)
    out_row = pl.pallas_call(
        selector_kernel,
        out_shape=jax.ShapeDtypeStruct((1, Bp), jnp.float32),
        grid_spec=pltpu.PrefetchScalarGridSpec(
            num_scalar_prefetch=0,
            grid=grid,
            in_specs=[
                pl.BlockSpec((tm, Dp), lambda i: (i, 0)),  # activations: batch-tiled
                pl.BlockSpec((1, Dp), lambda i: (0, 0)),   # weights: resident
            ],
            out_specs=pl.BlockSpec((1, tm), lambda i: (0, i)),  # lane-dense row
        ),
        compiler_params=pltpu.CompilerParams(
            dimension_semantics=("parallel",)),
    )(x_pad, w_pad)

    # (1, Bp) lane-dense row -> (B, 1) like the PyTorch module.
    return out_row[0, :B].reshape(B, 1).astype(dtype)


def init_params(key, input_dim, hidden=100):
    # PyTorch Linear default init: U(-1/sqrt(fan_in), +1/sqrt(fan_in)).
    k1, k2, k3, k4 = jax.random.split(key, 4)
    bound1 = 1.0 / jnp.sqrt(float(input_dim))
    bound2 = 1.0 / jnp.sqrt(float(hidden))
    w1 = jax.random.uniform(k1, (input_dim, hidden), jnp.float32, -bound1, bound1)
    b1 = jax.random.uniform(k2, (1, hidden), jnp.float32, -bound1, bound1)
    w2 = jax.random.uniform(k3, (hidden, 1), jnp.float32, -bound2, bound2)
    b2 = jax.random.uniform(k4, (1, 1), jnp.float32, -bound2, bound2)
    return w1, b1, w2, b2


if __name__ == "__main__":
    # Shapes implied by the module: hidden_dim=32, max_len=8
    # -> input_dim = 32*8 + 8 = 264; batch = 2.
    hidden_dim, max_len, batch = 32, 8, 2
    input_dim = hidden_dim * max_len + max_len

    key = jax.random.PRNGKey(0)
    k_x, k_p = jax.random.split(key)
    state_rep = jax.random.normal(k_x, (batch, input_dim), jnp.float32)
    w1, b1, w2, b2 = init_params(k_p, input_dim)

    out = selector_forward(state_rep, w1, b1, w2, b2)
    out = jax.block_until_ready(out)

    # Pure-JAX reference of the original (un-collapsed) two-layer module.
    ref = jax.nn.sigmoid((state_rep @ w1 + b1) @ w2 + b2)
    assert out.shape == (batch, 1)
    assert jnp.allclose(out, ref, atol=1e-4, rtol=1e-5), (out, ref)

    print("KERNEL_OK")
</pallas_src>

<mosaic_0001>
module attributes {stable_mosaic.version = 11 : i64} {
  func.func @selector_kernel(%arg0: i32, %arg1: memref<8x384xf32, #tpu.memory_space<vmem>>, %arg2: memref<1x384xf32, #tpu.memory_space<vmem>>, %arg3: memref<1x8xf32, #tpu.memory_space<vmem>>) attributes {dimension_semantics = [#tpu.dimension_semantics<parallel>], iteration_bounds = array<i64: 1>, scalar_prefetch = 0 : i64, scratch_operands = 0 : i64, tpu.core_type = #tpu.core_type<tc>, window_params = [{transform_indices = @transform_0, window_bounds = array<i64: 8, 384>}, {pipeline_mode = #tpu.pipeline_mode<synchronous>, transform_indices = @transform_1, window_bounds = array<i64: 1, 384>}, {transform_indices = @transform_2, window_bounds = array<i64: 1, 8>}]} {
    %c0 = arith.constant 0 : index
    %c0_0 = arith.constant 0 : index
    %0 = vector.load %arg2[%c0, %c0_0] : memref<1x384xf32, #tpu.memory_space<vmem>>, vector<1x384xf32>
    %c0_1 = arith.constant 0 : index
    %c0_2 = arith.constant 0 : index
    %1 = vector.load %arg1[%c0_1, %c0_2] : memref<8x384xf32, #tpu.memory_space<vmem>>, vector<8x384xf32>
    %cst = arith.constant dense<0.000000e+00> : vector<1x8xf32>
    %2 = tpu.matmul %0, %1, %cst {dimension_numbers = #tpu.dot_dimension_numbers<[1], [1], [0], [0], [0, 0, 1, 0], [], []>} : vector<1x384xf32>, vector<8x384xf32>, vector<1x8xf32> -> vector<1x8xf32>
    %3 = arith.negf %2 : vector<1x8xf32>
    %4 = math.exp %3 : vector<1x8xf32>
    %cst_3 = arith.constant 1.000000e+00 : f32
    %5 = vector.broadcast %cst_3 : f32 to vector<1x8xf32>
    %6 = arith.addf %5, %4 : vector<1x8xf32>
    %7 = arith.divf %5, %6 : vector<1x8xf32>
    %c0_4 = arith.constant 0 : index
    %c0_5 = arith.constant 0 : index
    %8 = vector.load %arg3[%c0_4, %c0_5] : memref<1x8xf32, #tpu.memory_space<vmem>>, vector<1x8xf32>
    tpu.vector_store %arg3[%c0_4, %c0_5], %7 {strides = array<i32>} : memref<1x8xf32, #tpu.memory_space<vmem>>, vector<1x8xf32>,
    return
  }
  func.func @transform_0(%arg0: i32) -> (i32, i32) {
    %c0_i32 = arith.constant 0 : i32
    %c0_i32_0 = arith.constant 0 : i32
    return %arg0, %c0_i32 : i32, i32
  }
  func.func @transform_1(%arg0: i32) -> (i32, i32) {
    %c0_i32 = arith.constant 0 : i32
    %c0_i32_0 = arith.constant 0 : i32
    %c0_i32_1 = arith.constant 0 : i32
    return %c0_i32, %c0_i32_0 : i32, i32
  }
  func.func @transform_2(%arg0: i32) -> (i32, i32) {
    %c0_i32 = arith.constant 0 : i32
    %c0_i32_0 = arith.constant 0 : i32
    return %c0_i32, %arg0 : i32, i32
  }
}

</mosaic_0001>

<bundles_post_ra>
// kernel: tpu_custom_call.1
= control target key start
LH: loop header
LB: loop body
LE: loop exit
PB: predicated region body
PF: predicated region fallthrough
CT: control target
= control target key end

     0   :  { %7 = vsyncpa [#allocation3], 0  ;;  %s332_s0 = inlined_call_operand.hbm [shape: f32[8,384], index: 0, kind: input, shape index: {}]   ;;  %s333_s1 = inlined_call_operand.hbm [shape: f32[1,384], index: 1, kind: input, shape index: {}]   ;;  %s334_s2 = inlined_call_operand.hbm [shape: f32[1,8], index: 2, kind: output, shape index: {}]  }
   0x1   :  { %8 = vsyncpa [#allocation6], 0 }
   0x2   :  { %9 = vsyncpa [#allocation4], 0  ;;  %s303_s9 = smov [#allocation2]   ;;  %s304_s11 = smov [#allocation5]  }
   0x3   :  { %s16_s10 = sshll.u32 %s303_s9, 4  ;;  %s26_s12 = sshll.u32 %s304_s11, 4  ;;  %s17_s10 = int_to_ptr.vmem [resolvable:$true] %s16_s10  ;;  %s27_s12 = int_to_ptr.vmem [resolvable:$true] %s26_s12 }
   0x4   :  { %s245_s13 = scalar_lea.vmem %s17_s10, 384  ;;  %p250_p1 = scmp.lt.s32.totalorder %s17_s10, %s17_s10 }
   0x5   :  { %p246_p0 = scmp.ne.s32.totalorder %s17_s10, %s245_s13  ;;  %p251_p2 = scmp.lt.s32.totalorder %s245_s13, %s245_s13 }
   0x7   :  { %p252_p3 = por %p251_p2, %p250_p1 }
   0x9   :  { %p253_p4 = pnand %p252_p3, %p246_p0 }
   0xb   :  { %256 = shalt.err (!%p253_p4)
}
   0xc   :  { %19 = dma.hbm_to_vmem [thread:$0]  %s332_s0, 384, %s17_s10, [#allocation3]  }
   0xd   :  { %s265_s16 = scalar_lea.vmem %s27_s12, 48  ;;  %s269_s17 = scalar_lea.vmem %s27_s12, 64 }
   0xe   :  { %p266_p5 = scmp.ne.s32.totalorder %s27_s12, %s265_s16  ;;  %p270_p6 = scmp.lt.s32.totalorder %s27_s12, %s27_s12 }
   0xf   :  { %p271_p7 = scmp.lt.s32.totalorder %s269_s17, %s265_s16 }
  0x11   :  { %p272_p8 = por %p271_p7, %p270_p6 }
  0x13   :  { %p273_p9 = pnand %p272_p8, %p266_p5 }
  0x15   :  { %276 = shalt.err (!%p273_p9)
}
  0x16   :  { %29 = dma.hbm_to_vmem [thread:$0]  %s333_s1, 48, %s27_s12, [#allocation6]  }
  0x17   :  { %297 = dma.done.wait [#allocation3], 384  }
  0x18   :  { %298 = vsyncadd [#allocation3], 4294966912 }
  0x19   :  { %299 = dma.done.wait [#allocation6], 48  }
  0x1a   :  { %300 = vsyncadd [#allocation6], 4294967248  ;;  %v41_v0 = vlaneseq  ;;  %v305_v1 = vmov 0.0   ;;  %vm306_vm0 = vmmov 0   ;;  %v38_v6 = vld [vmem:[#allocation2 + $0x8] sm:$0xff]  ;;  %v39_v7 = vld [vmem:[#allocation2 + $0x10] sm:$0xff] }
  0x1b   :  { %223 = vmatprep.subr.mxu1 %v305_v1  ;;  %225 = vmatprep.mubr.msk.f32.mxu1 %vm306_vm0, %v305_v1  ;;  %v37_v8 = vld [vmem:[#allocation2] sm:$0xff]  ;;  %v36_v9 = vld [vmem:[#allocation5] sm:$0x7]  ;;  %s307_s0 = smov [#allocation7]   ;;  %vm202_vm1 = vcmask 57344  }
  0x1c   :  { %v42_v2 = vshrl.u32 %v41_v0, 7  ;;  %86 = vmatprep.subr.mxu0 %v38_v6  ;;  %224 = vmatpush3.xpose.msra.mxu1 %v39_v7  ;;  %s210_s1 = sshll.u32 %s307_s0, 4  ;;  %s211_s1 = int_to_ptr.vmem [resolvable:$true] %s210_s1 }
  0x1d   :  { %87 = vmatpush1.xpose.msra.mxu0 %v37_v8  ;;  %s277_s20 = scalar_lea.vmem %s211_s1, 16  ;;  %s281_s21 = scalar_lea.vmem %s211_s1, 32 }
  0x1e   :  { %v47_v3 = vsub.s32 1, %v42_v2  ;;  %v51_v4 = vsub.s32 2, %v42_v2  ;;  %v43_v5 = vsub.s32 0, %v42_v2  ;;  %p278_p10 = scmp.ne.s32.totalorder %s211_s1, %s277_s20  ;;  %p282_p11 = scmp.lt.s32.totalorder %s211_s1, %s211_s1 }
  0x1f   :  { %p283_p12 = scmp.lt.s32.totalorder %s281_s21, %s277_s20 }
  0x20   :  { %v48_v10 = vrot.slane %v36_v9, %v47_v3  ;;  %v52_v11 = vrot.slane %v36_v9, %v51_v4  ;;  %v44_v12 = vrot.slane %v36_v9, %v43_v5 }
  0x21   :  { %p284_p13 = por %p283_p12, %p282_p11 }
  0x22   :  { %120 = vmatprep.mubr.f32.mxu0 %v48_v10  ;;  %226 = vmatmul.mubr.f32.vlgmr.msra.gmra.mxu1 %v52_v11 }
  0x23   :  { %121 = vmatmul.mubr.f32.vlgmr.msra.gmra.mxu0 %v44_v12  ;;  %p285_p0 = pnand %p284_p13, %p278_p10 }
  0xe2   :  { %v192_v13 = vpop.f32.mrf.mxu1 }
  0xe3   :  { %v122_v14 = vpop.f32.mrf.mxu0 }
  0xe4   :  { %v193_v15 = vadd.f32 %v192_v13, %v122_v14  ;;  %v227_v16 = vpop.f32.mrf.mxu1 }
  0xe5   :  { %v124_v17 = vpop.f32.mrf.mxu0 }
  0xe6   :  { %v220_v18 = vmul.f32 -1.442695, %v193_v15 }
  0xe8   :  { %233 = vpow2.f32 %v220_v18 }
  0xf5   :  { %v234_v19 = vpop.eup %233 }
  0xf6   :  { %v199_v20 = vadd.f32 1.0, %v234_v19 }
  0xf8   :  { %235 = vrcp.f32 %v199_v20 }
 0x105   :  { %v236_v21 = vpop.eup %235 }
 0x106   :  { %203 = vst.msk [vmem:[#allocation7] sm:$0x1] %vm202_vm1, %v236_v21 }
 0x107   :  { %288 = shalt.err (!%p285_p0)
}
 0x108   :  { %213 = dma.vmem_to_hbm [thread:$0]  %s211_s1, 16, %s334_s2, [#allocation4]  }
 0x109   :  { %301 = dma.done.wait [#allocation4], 16  }
 0x10a   :  { %302 = vsyncadd [#allocation4], 4294967280 }
 0x10b   :  { %217 = vsyncpa [#allocation3], 1 }
 0x10c   :  { %218 = vsyncpa [#allocation6], 1 }
 0x10d   :  { %219 = vsyncpa [#allocation4], 1 }

</bundles_post_ra>
